<compile_context>
chip_gen: v6e
topology: v6e:2x2x1
jax: 0.10.0
libtpu: 0.0.40
codegen_flags: <defaults>
</compile_context>

<pallas_src>
import jax
import jax.numpy as jnp
from jax.experimental import pallas as pl
from jax.experimental.pallas import tpu as pltpu


def _make_kernel(NC, W_pad):
    """Per-(image, spatial-tile) kernel.

    refs:
      xc_ref : (C, T)         bf16  current tile of the flattened padded image
      xh_ref : (C, THALO)     bf16  halo (first THALO elements past the tile)
      w1_ref : (C_hid, 9*C)   bf16  3x3 conv weight, tap-major columns
      b1_ref : (C_hid, 1)     f32
      wh_ref : (NC+4, C_hid)  bf16  fused cls|reg 1x1 head weight
      bh_ref : (NC+4, 1)      f32
      out_ref: (NC+4, T)      bf16  fused output: rows [:NC] sigmoid scores,
                                    rows [NC:] bbox deltas (lane-dense)
    """
    # Flat offset of conv tap (kh, kw) in the row-major flattened, (H+2, W+2)
    # zero-padded image: out position p = h*W_pad + w reads p + kh*W_pad + kw.
    offs = tuple(kh * W_pad + kw for kh in range(3) for kw in range(3))

    def kernel(xc_ref, xh_ref, w1_ref, b1_ref, wh_ref, bh_ref, out_ref):
        xc = xc_ref[...]                                   # (C, T)     bf16
        xh = xh_ref[...]                                   # (C, THALO) bf16
        # Build the (9*C, T) shifted-taps operand directly from tile + halo
        # (no HBM im2col, no full-window concatenate copy).
        pieces = []
        for o in offs:
            if o == 0:
                pieces.append(xc)
            else:
                pieces.append(jnp.concatenate([xc[:, o:], xh[:, :o]], axis=-1))
        taps = jnp.concatenate(pieces, axis=0)             # (9*C, T) bf16
        # 3x3 conv as ONE K=9*C MXU matmul with f32 accumulation.
        acc = jnp.dot(w1_ref[...], taps,
                      preferred_element_type=jnp.float32)  # (C_hid, T) f32
        h = jnp.maximum(acc + b1_ref[...], 0.0)
        # Fused cls|reg head: one (NC+4, C_hid) x (C_hid, T) matmul.
        o_ = jnp.dot(wh_ref[...], h.astype(jnp.bfloat16),
                     preferred_element_type=jnp.float32) + bh_ref[...]
        # Sigmoid only on class rows; row mask avoids sublane splits for any NC.
        row = jax.lax.broadcasted_iota(jnp.int32, o_.shape, 0)
        out = jnp.where(row < NC, jax.nn.sigmoid(o_), o_)
        out_ref[...] = out.astype(out_ref.dtype)

    return kernel


def detector_forward(x, params, *, tile_hw=4096, out_dtype=jnp.bfloat16):
    """Inference forward. x: [B, C, H, W] float32 (NCHW).

    Returns ([B, num_classes, H, W] sigmoid scores, [B, 4, H, W] bbox deltas),
    both in `out_dtype` (bf16 by default).
    """
    w1f, b1, whT, bh = params
    B, C, H, W = x.shape
    NCR, C_hid = whT.shape
    NC = NCR - 4
    assert w1f.shape == (C_hid, 9 * C)

    Wp = W + 2                       # width of the zero-padded image
    Lout = H * Wp                    # "extended" flat output (2 junk cols / row)
    max_off = 2 * Wp + 2             # largest 3x3 tap offset in the flat layout

    # Halo quantum: one lane-aligned chunk big enough to cover all tap offsets.
    THALO = 128 * ((max_off + 127) // 128)
    # Tile: multiple of THALO (halo block index stays integral), as close to
    # tile_hw as possible, but never bigger than the (rounded-up) image so
    # small images / B>=2 still give the grid >=2 steps (feeds both v7x TCs).
    T = max(THALO, (int(tile_hw) // THALO) * THALO)
    Lout_ceil = THALO * ((Lout + THALO - 1) // THALO)
    T = min(T, Lout_ceil)
    n_tiles = (Lout + T - 1) // T
    Lout_pad = n_tiles * T
    step = T // THALO                # halo block-index stride
    Lin_need = Lout_pad + THALO      # last halo must be fully in-bounds

    # --- fused prologue: cast to bf16 FIRST, then ONE pad covering both the
    #     conv zero-pad and the tile/halo tail, then flatten spatial. ---
    H_tot = (Lin_need + Wp - 1) // Wp          # >= H + 2 rows after padding
    xb = x.astype(jnp.bfloat16)
    xp = jnp.pad(xb, ((0, 0), (0, 0), (1, H_tot - H - 1), (1, 1)))
    xf = xp.reshape(B, C, H_tot * Wp)          # (B, C, Lflat), Lflat >= Lin_need

    kernel = _make_kernel(NC, Wp)

    grid_spec = pltpu.PrefetchScalarGridSpec(
        num_scalar_prefetch=0,
        grid=(B, n_tiles),
        in_specs=[
            # current spatial tile of the flattened padded image
            pl.BlockSpec((None, C, T), lambda b, t: (b, 0, t)),
            # halo: first THALO elements past the tile end
            pl.BlockSpec((None, C, THALO), lambda b, t: (b, 0, (t + 1) * step)),
            pl.BlockSpec((C_hid, 9 * C), lambda b, t: (0, 0)),   # conv weight
            pl.BlockSpec((C_hid, 1), lambda b, t: (0, 0)),       # conv bias
            pl.BlockSpec((NCR, C_hid), lambda b, t: (0, 0)),     # fused head w
            pl.BlockSpec((NCR, 1), lambda b, t: (0, 0)),         # fused head b
        ],
        out_specs=pl.BlockSpec((None, NCR, T), lambda b, t: (b, 0, t)),
    )

    out_isize = jnp.dtype(out_dtype).itemsize
    cost = pl.CostEstimate(
        flops=2 * B * Lout_pad * C_hid * (9 * C + NCR),
        transcendentals=B * Lout_pad * NCR,
        bytes_accessed=int(
            2 * B * C * (H_tot * Wp)              # image read (bf16)
            + 2 * B * C * n_tiles * THALO         # halo re-reads
            + 2 * w1f.size + 4 * b1.size + 2 * whT.size + 4 * bh.size
            + out_isize * B * NCR * Lout_pad),    # fused output write
    )

    out = pl.pallas_call(
        kernel,
        out_shape=jax.ShapeDtypeStruct((B, NCR, Lout_pad), out_dtype),
        grid_spec=grid_spec,
        compiler_params=pltpu.CompilerParams(
            dimension_semantics=("parallel", "parallel")),
        cost_estimate=cost,
    )(xf, xf, w1f, b1, whT, bh)

    # --- epilogue (bf16 pass): drop the 2 junk pad columns per row, split the
    #     fused cls|reg rows.  Output is already channel-major (no transpose).
    # TODO(synk): downstream bbox decode / NMS could consume the padded
    #             (NCR, H, W+2) layout directly and skip this slice pass.
    o = out[:, :, :Lout].reshape(B, NCR, H, Wp)[..., :W]
    cls_scores = o[:, :NC]
    bbox_preds = o[:, NC:]
    return cls_scores, bbox_preds


def init_params(key, c_in, c_hid, num_classes):
    """Weights stored pre-transposed / fused for the lane-dense kernel layout.

    w1f: (c_hid, 9*c_in) 3x3 conv weight, tap-major columns.  A PyTorch OIHW
         conv weight maps as w1f[o, (kh*3 + kw)*c_in + c] = w_torch[o, c, kh, kw].
    whT: (num_classes + 4, c_hid) fused cls|reg 1x1 head weight (cls rows first).
    """
    k1, k2 = jax.random.split(key)
    fan_in = 9 * c_in
    w1f = (jax.random.normal(k1, (c_hid, 9 * c_in), jnp.float32)
           / jnp.sqrt(fan_in)).astype(jnp.bfloat16)
    b1 = jnp.zeros((c_hid, 1), jnp.float32)
    ncr = num_classes + 4
    whT = (jax.random.normal(k2, (ncr, c_hid), jnp.float32)
           / jnp.sqrt(c_hid)).astype(jnp.bfloat16)
    bh = jnp.concatenate(
        [jnp.full((num_classes, 1), -2.0, jnp.float32),   # focal-loss prior (cls)
         jnp.zeros((4, 1), jnp.float32)], axis=0)
    return w1f, b1, whT, bh


if __name__ == "__main__":
    key = jax.random.PRNGKey(0)
    kx, kp = jax.random.split(key)

    B, C, H, W = 2, 4, 16, 16
    C_hid, NUM_CLASSES = 32, 8

    x = jax.random.normal(kx, (B, C, H, W), jnp.float32)   # NCHW input
    params = init_params(kp, C, C_hid, NUM_CLASSES)

    fwd = jax.jit(detector_forward)
    cls_scores, bbox_preds = fwd(x, params)
    jax.block_until_ready((cls_scores, bbox_preds))

    assert cls_scores.shape == (B, NUM_CLASSES, H, W)
    assert bbox_preds.shape == (B, 4, H, W)

    # Pure-JAX reference (same bf16 quantization points, f32 accumulation).
    w1f, b1, whT, bh = params
    xr = x.astype(jnp.bfloat16).astype(jnp.float32)
    w_conv = jnp.transpose(
        w1f.astype(jnp.float32).reshape(C_hid, 3, 3, C), (0, 3, 1, 2))   # OIHW
    h_ref = jax.lax.conv_general_dilated(
        xr, w_conv, (1, 1), 'SAME',
        dimension_numbers=('NCHW', 'OIHW', 'NCHW'),
        precision=jax.lax.Precision.HIGHEST)
    h_ref = jnp.maximum(h_ref + b1.reshape(1, C_hid, 1, 1), 0.0)
    h_ref = h_ref.astype(jnp.bfloat16).astype(jnp.float32)
    o_ref = jnp.einsum('of,bfhw->bohw', whT.astype(jnp.float32), h_ref,
                       precision=jax.lax.Precision.HIGHEST) + bh.reshape(1, -1, 1, 1)
    cls_ref = jax.nn.sigmoid(o_ref[:, :NUM_CLASSES])
    cls_ref = cls_ref.astype(jnp.bfloat16).astype(jnp.float32)
    reg_ref = o_ref[:, NUM_CLASSES:].astype(jnp.bfloat16).astype(jnp.float32)

    assert jnp.allclose(cls_scores.astype(jnp.float32), cls_ref,
                        atol=2e-2, rtol=2e-2), "cls mismatch"
    assert jnp.allclose(bbox_preds.astype(jnp.float32), reg_ref,
                        atol=2e-2, rtol=2e-2), "reg mismatch"

    print("KERNEL_OK")
</pallas_src>

<mosaic_0001>
module attributes {stable_mosaic.version = 11 : i64} {
  func.func @kernel(%arg0: i32, %arg1: i32, %arg2: memref<1x4x384xbf16, #tpu.memory_space<vmem>>, %arg3: memref<1x4x128xbf16, #tpu.memory_space<vmem>>, %arg4: memref<32x36xbf16, #tpu.memory_space<vmem>>, %arg5: memref<32x1xf32, #tpu.memory_space<vmem>>, %arg6: memref<12x32xbf16, #tpu.memory_space<vmem>>, %arg7: memref<12x1xf32, #tpu.memory_space<vmem>>, %arg8: memref<1x12x384xbf16, #tpu.memory_space<vmem>>) attributes {dimension_semantics = [#tpu.dimension_semantics<parallel>, #tpu.dimension_semantics<parallel>], iteration_bounds = array<i64: 2, 1>, scalar_prefetch = 0 : i64, scratch_operands = 0 : i64, tpu.core_type = #tpu.core_type<tc>, window_params = [{transform_indices = @transform_0, window_bounds = array<i64: 1, 4, 384>}, {transform_indices = @transform_1, window_bounds = array<i64: 1, 4, 128>}, {pipeline_mode = #tpu.pipeline_mode<synchronous>, transform_indices = @transform_2, window_bounds = array<i64: 32, 36>}, {pipeline_mode = #tpu.pipeline_mode<synchronous>, transform_indices = @transform_3, window_bounds = array<i64: 32, 1>}, {pipeline_mode = #tpu.pipeline_mode<synchronous>, transform_indices = @transform_4, window_bounds = array<i64: 12, 32>}, {pipeline_mode = #tpu.pipeline_mode<synchronous>, transform_indices = @transform_5, window_bounds = array<i64: 12, 1>}, {transform_indices = @transform_6, window_bounds = array<i64: 1, 12, 384>}]} {
    %c0 = arith.constant 0 : index
    %c0_0 = arith.constant 0 : index
    %c0_1 = arith.constant 0 : index
    %0 = vector.load %arg2[%c0, %c0_0, %c0_1] : memref<1x4x384xbf16, #tpu.memory_space<vmem>>, vector<1x4x384xbf16>
    %1 = vector.shape_cast %0 : vector<1x4x384xbf16> to vector<4x384xbf16>
    %c0_2 = arith.constant 0 : index
    %c0_3 = arith.constant 0 : index
    %c0_4 = arith.constant 0 : index
    %2 = vector.load %arg3[%c0_2, %c0_3, %c0_4] : memref<1x4x128xbf16, #tpu.memory_space<vmem>>, vector<1x4x128xbf16>
    %3 = vector.shape_cast %2 : vector<1x4x128xbf16> to vector<4x128xbf16>
    %4 = vector.extract_strided_slice %1 {offsets = [0, 1], sizes = [4, 383], strides = [1, 1]} : vector<4x384xbf16> to vector<4x383xbf16>
    %5 = vector.extract_strided_slice %3 {offsets = [0, 0], sizes = [4, 1], strides = [1, 1]} : vector<4x128xbf16> to vector<4x1xbf16>
    %6 = tpu.concatenate %4, %5 in 1 : vector<4x383xbf16>, vector<4x1xbf16> -> vector<4x384xbf16>
    %7 = vector.extract_strided_slice %1 {offsets = [0, 2], sizes = [4, 382], strides = [1, 1]} : vector<4x384xbf16> to vector<4x382xbf16>
    %8 = vector.extract_strided_slice %3 {offsets = [0, 0], sizes = [4, 2], strides = [1, 1]} : vector<4x128xbf16> to vector<4x2xbf16>
    %9 = tpu.concatenate %7, %8 in 1 : vector<4x382xbf16>, vector<4x2xbf16> -> vector<4x384xbf16>
    %10 = vector.extract_strided_slice %1 {offsets = [0, 18], sizes = [4, 366], strides = [1, 1]} : vector<4x384xbf16> to vector<4x366xbf16>
    %11 = vector.extract_strided_slice %3 {offsets = [0, 0], sizes = [4, 18], strides = [1, 1]} : vector<4x128xbf16> to vector<4x18xbf16>
    %12 = tpu.concatenate %10, %11 in 1 : vector<4x366xbf16>, vector<4x18xbf16> -> vector<4x384xbf16>
    %13 = vector.extract_strided_slice %1 {offsets = [0, 19], sizes = [4, 365], strides = [1, 1]} : vector<4x384xbf16> to vector<4x365xbf16>
    %14 = vector.extract_strided_slice %3 {offsets = [0, 0], sizes = [4, 19], strides = [1, 1]} : vector<4x128xbf16> to vector<4x19xbf16>
    %15 = tpu.concatenate %13, %14 in 1 : vector<4x365xbf16>, vector<4x19xbf16> -> vector<4x384xbf16>
    %16 = vector.extract_strided_slice %1 {offsets = [0, 20], sizes = [4, 364], strides = [1, 1]} : vector<4x384xbf16> to vector<4x364xbf16>
    %17 = vector.extract_strided_slice %3 {offsets = [0, 0], sizes = [4, 20], strides = [1, 1]} : vector<4x128xbf16> to vector<4x20xbf16>
    %18 = tpu.concatenate %16, %17 in 1 : vector<4x364xbf16>, vector<4x20xbf16> -> vector<4x384xbf16>
    %19 = vector.extract_strided_slice %1 {offsets = [0, 36], sizes = [4, 348], strides = [1, 1]} : vector<4x384xbf16> to vector<4x348xbf16>
    %20 = vector.extract_strided_slice %3 {offsets = [0, 0], sizes = [4, 36], strides = [1, 1]} : vector<4x128xbf16> to vector<4x36xbf16>
    %21 = tpu.concatenate %19, %20 in 1 : vector<4x348xbf16>, vector<4x36xbf16> -> vector<4x384xbf16>
    %22 = vector.extract_strided_slice %1 {offsets = [0, 37], sizes = [4, 347], strides = [1, 1]} : vector<4x384xbf16> to vector<4x347xbf16>
    %23 = vector.extract_strided_slice %3 {offsets = [0, 0], sizes = [4, 37], strides = [1, 1]} : vector<4x128xbf16> to vector<4x37xbf16>
    %24 = tpu.concatenate %22, %23 in 1 : vector<4x347xbf16>, vector<4x37xbf16> -> vector<4x384xbf16>
    %25 = vector.extract_strided_slice %1 {offsets = [0, 38], sizes = [4, 346], strides = [1, 1]} : vector<4x384xbf16> to vector<4x346xbf16>
    %26 = vector.extract_strided_slice %3 {offsets = [0, 0], sizes = [4, 38], strides = [1, 1]} : vector<4x128xbf16> to vector<4x38xbf16>
    %27 = tpu.concatenate %25, %26 in 1 : vector<4x346xbf16>, vector<4x38xbf16> -> vector<4x384xbf16>
    %28 = tpu.concatenate %1, %6, %9, %12, %15, %18, %21, %24, %27 in 0 : vector<4x384xbf16>, vector<4x384xbf16>, vector<4x384xbf16>, vector<4x384xbf16>, vector<4x384xbf16>, vector<4x384xbf16>, vector<4x384xbf16>, vector<4x384xbf16>, vector<4x384xbf16> -> vector<36x384xbf16>
    %c0_5 = arith.constant 0 : index
    %c0_6 = arith.constant 0 : index
    %29 = vector.load %arg4[%c0_5, %c0_6] : memref<32x36xbf16, #tpu.memory_space<vmem>>, vector<32x36xbf16>
    %cst = arith.constant dense<0.000000e+00> : vector<32x384xf32>
    %30 = tpu.matmul %29, %28, %cst {dimension_numbers = #tpu.dot_dimension_numbers<[1], [0], [0], [1], [0, 0, 1, 1], [], []>} : vector<32x36xbf16>, vector<36x384xbf16>, vector<32x384xf32> -> vector<32x384xf32>
    %c0_7 = arith.constant 0 : index
    %c0_8 = arith.constant 0 : index
    %31 = vector.load %arg5[%c0_7, %c0_8] : memref<32x1xf32, #tpu.memory_space<vmem>>, vector<32x1xf32>
    %32 = vector.broadcast %31 : vector<32x1xf32> to vector<32x384xf32>
    %33 = arith.addf %30, %32 : vector<32x384xf32>
    %cst_9 = arith.constant 0.000000e+00 : f32
    %34 = vector.broadcast %cst_9 : f32 to vector<32x384xf32>
    %35 = arith.maximumf %33, %34 : vector<32x384xf32>
    %c0_10 = arith.constant 0 : index
    %c0_11 = arith.constant 0 : index
    %36 = vector.load %arg6[%c0_10, %c0_11] : memref<12x32xbf16, #tpu.memory_space<vmem>>, vector<12x32xbf16>
    %37 = arith.truncf %35 : vector<32x384xf32> to vector<32x384xbf16>
    %cst_12 = arith.constant dense<0.000000e+00> : vector<12x384xf32>
    %38 = tpu.matmul %36, %37, %cst_12 {dimension_numbers = #tpu.dot_dimension_numbers<[1], [0], [0], [1], [0, 0, 1, 1], [], []>} : vector<12x32xbf16>, vector<32x384xbf16>, vector<12x384xf32> -> vector<12x384xf32>
    %c0_13 = arith.constant 0 : index
    %c0_14 = arith.constant 0 : index
    %39 = vector.load %arg7[%c0_13, %c0_14] : memref<12x1xf32, #tpu.memory_space<vmem>>, vector<12x1xf32>
    %40 = vector.broadcast %39 : vector<12x1xf32> to vector<12x384xf32>
    %41 = arith.addf %38, %40 : vector<12x384xf32>
    %42 = tpu.iota {dimensions = array<i32: 0>} : vector<12x384xi32>
    %c8_i32 = arith.constant 8 : i32
    %43 = vector.broadcast %c8_i32 : i32 to vector<12x384xi32>
    %44 = arith.cmpi slt, %42, %43 : vector<12x384xi32>
    %45 = arith.negf %41 : vector<12x384xf32>
    %46 = math.exp %45 : vector<12x384xf32>
    %cst_15 = arith.constant 1.000000e+00 : f32
    %47 = vector.broadcast %cst_15 : f32 to vector<12x384xf32>
    %48 = arith.addf %47, %46 : vector<12x384xf32>
    %49 = arith.divf %47, %48 : vector<12x384xf32>
    %50 = arith.select %44, %49, %41 : vector<12x384xi1>, vector<12x384xf32>
    %51 = arith.truncf %50 : vector<12x384xf32> to vector<12x384xbf16>
    %c0_16 = arith.constant 0 : index
    %c0_17 = arith.constant 0 : index
    %c0_18 = arith.constant 0 : index
    %52 = vector.load %arg8[%c0_16, %c0_17, %c0_18] : memref<1x12x384xbf16, #tpu.memory_space<vmem>>, vector<1x12x384xbf16>
    %53 = vector.shape_cast %52 : vector<1x12x384xbf16> to vector<12x384xbf16>
    %54 = vector.shape_cast %51 : vector<12x384xbf16> to vector<1x12x384xbf16>
    tpu.vector_store %arg8[%c0_16, %c0_17, %c0_18], %54 {strides = array<i32>} : memref<1x12x384xbf16, #tpu.memory_space<vmem>>, vector<1x12x384xbf16>,
    return
  }
  func.func @transform_0(%arg0: i32, %arg1: i32) -> (i32, i32, i32) {
    %c0_i32 = arith.constant 0 : i32
    %c0_i32_0 = arith.constant 0 : i32
    return %arg0, %c0_i32, %arg1 : i32, i32, i32
  }
  func.func @transform_1(%arg0: i32, %arg1: i32) -> (i32, i32, i32) {
    %c1_i32 = arith.constant 1 : i32
    %0 = arith.addi %arg1, %c1_i32 : i32
    %c3_i32 = arith.constant 3 : i32
    %1 = arith.muli %0, %c3_i32 : i32
    %c0_i32 = arith.constant 0 : i32
    %c0_i32_0 = arith.constant 0 : i32
    return %arg0, %c0_i32, %1 : i32, i32, i32
  }
  func.func @transform_2(%arg0: i32, %arg1: i32) -> (i32, i32) {
    %c0_i32 = arith.constant 0 : i32
    %c0_i32_0 = arith.constant 0 : i32
    %c0_i32_1 = arith.constant 0 : i32
    return %c0_i32, %c0_i32_0 : i32, i32
  }
  func.func @transform_3(%arg0: i32, %arg1: i32) -> (i32, i32) {
    %c0_i32 = arith.constant 0 : i32
    %c0_i32_0 = arith.constant 0 : i32
    %c0_i32_1 = arith.constant 0 : i32
    return %c0_i32, %c0_i32_0 : i32, i32
  }
  func.func @transform_4(%arg0: i32, %arg1: i32) -> (i32, i32) {
    %c0_i32 = arith.constant 0 : i32
    %c0_i32_0 = arith.constant 0 : i32
    %c0_i32_1 = arith.constant 0 : i32
    return %c0_i32, %c0_i32_0 : i32, i32
  }
  func.func @transform_5(%arg0: i32, %arg1: i32) -> (i32, i32) {
    %c0_i32 = arith.constant 0 : i32
    %c0_i32_0 = arith.constant 0 : i32
    %c0_i32_1 = arith.constant 0 : i32
    return %c0_i32, %c0_i32_0 : i32, i32
  }
  func.func @transform_6(%arg0: i32, %arg1: i32) -> (i32, i32, i32) {
    %c0_i32 = arith.constant 0 : i32
    %c0_i32_0 = arith.constant 0 : i32
    return %arg0, %c0_i32, %arg1 : i32, i32, i32
  }
}

</mosaic_0001>

<bundles_post_ra>
// kernel: detector_forward.1
= control target key start
LH: loop header
LB: loop body
LE: loop exit
PB: predicated region body
PF: predicated region fallthrough
CT: control target
= control target key end

     0   :  { %s1227_s21 = smov 0   ;;  %s1229_s22 = smov 0   ;;  %s1432_s0 = inlined_call_operand.vmem [shape: bf16[2,4,522], index: 0, kind: input, shape index: {}, may-alias: {0,1}]   ;;  %s1433_s1 = inlined_call_operand.vmem [shape: bf16[2,4,522], index: 1, kind: input, shape index: {}, may-alias: {0,1}]   ;;  %s1434_s2 = inlined_call_operand.vmem [shape: bf16[32,36], index: 2, kind: input, shape index: {}]   ;;  %s1435_s3 = inlined_call_operand.vmem [shape: f32[32,1], index: 3, kind: input, shape index: {}]   ;;  %s1436_s4 = inlined_call_operand.vmem [shape: bf16[12,32], index: 4, kind: input, shape index: {}]   ;;  %s1437_s5 = inlined_call_operand.vmem [shape: f32[12,1], index: 5, kind: input, shape index: {}]   ;;  %s1438_s6 = inlined_call_operand.vmem [shape: bf16[2,12,384], index: 6, kind: output, shape index: {}]  }
   0x1   :  { %s1231_s23 = smov 0  }
   0x2 LB: > { %s28_s24 = sadd.s32 1, %s1174_s22  ;;  %p1038_p0 = scmp.ge.s32.totalorder %s1178_s23, 1  ;;  %s1178_s23 = sphi %s1231_s23, %s16_s23   ;;  %s1174_s22 = sphi %s1229_s22, %s1440_s22   ;;  %s1170_s21 = sphi %s1227_s21, %s1439_s21  }
   0x3   : > { %p30_p1 = scmp.ge.s32.totalorder %s28_s24, 2  ;;  %p264_p2 = scmp.lt.s32.totalorder %s1178_s23, 3 }
   0x5   : > { %s1442_s24 = smov (%p30_p1, %s28_s24), 0  ;;  %p265_p3 = pnand %p1038_p0, %p264_p2 }
   0x6   : > { %p321_p4 = scmp.lt.s32.totalorder (!%p265_p3), %s1170_s21, 1  ;;  %s1181_s29 = smov (!%p265_p3), 108  }
   0x7   : > { %268 = sbr.rel (%p265_p3) target bundleno = 647 (0x287), region = 44  ;;  %s1182_s30 = smov (!%p265_p3), 90  }
   0x8   : > { %s1183_s7 = smov (!%p265_p3), 92   ;;  %s1184_s8 = smov (!%p265_p3), 109  }
   0x9   : > { %s1185_s9 = smov (!%p265_p3), 91   ;;  %s1186_s10 = smov (!%p265_p3), 127  }
   0xa   : > { %s1187_s11 = smov (!%p265_p3), 126   ;;  %s1188_s15 = smov (!%p265_p3), 110  }
   0xc   : > { %v364_v0 = vlaneseq  ;;  %v1180_v1 = vmov 1983009808   ;;  %s1444_s21 = smov (!%p321_p4, %s1170_s21), 1  ;;  %v1301_v11 = vld [vmem:[%s1434_s2] sm:$0xff]   ;;  %v1189_v12 = vmov 0   ;;  %vm616_vm0 = vcmask 293888  }
   0xd   : > { %v362_v2 = vunpack.c.l.s4 %v1180_v1  ;;  %s1098_s25 = smul.u32 10, %s1444_s21  ;;  %663 = vmatprep.mubr.bf16.mxu0 %v1189_v12  ;;  %1085 = vmatprep.mubr.msk.bf16.mxu1 %vm616_vm0, %v1301_v11  ;;  %v585_v14 = vld [vmem:[%s1435_s3 + $0x18] sm:$0xff]  ;;  %v584_v15 = vld [vmem:[%s1435_s3 + $0x10] sm:$0xff]  ;;  %v582_v16 = vld [vmem:[%s1435_s3] sm:$0xff]  ;;  %vm495_vm1 = vcmask 736256   ;;  %vm528_vm2 = vcmask 1041408  }
   0xe   : > { %v365_v3 = vshrl.u32 %v364_v0, 7  ;;  %1139 = vset.pattern.permute.xlu1 %v1189_v12  ;;  %1138 = vset.pattern.permute.xlu0 %v1189_v12  ;;  %v583_v17 = vld [vmem:[%s1435_s3 + $0x8] sm:$0xff]  ;;  %v753_v18 = vld [vmem:[%s1437_s5] sm:$0xff]  ;;  %vm450_vm3 = vcmask 883712   ;;  %vm435_vm4 = vcmask 891904   ;;  %vm465_vm5 = vcmask 752640  }
   0xf   : > { %v363_v4 = vunpack.c.0.s8 %v362_v2  ;;  %s328_s28 = scalar_lea.vmem %s1432_s0, %s1098_s25  ;;  %s1066_s12 = sadd.s32 6, %s1098_s25  ;;  %v754_v19 = vld [vmem:[%s1437_s5 + $0x8] sm:$0xf]  ;;  %vm480_vm6 = vcmask 744448   ;;  %vm538_vm7 = vcmask 1043456   ;;  %vm545_vm8 = vcmask 1045504  }
  0x10   : > { %v357_v6 = vld [vmem:[%s328_s28] sm:$0x3f]  ;;  %s343_s18 = scalar_lea.vmem %s1433_s1, %s1066_s12  ;;  %vm382_vm9 = vcmask 1039360   ;;  %vm405_vm10 = vcmask 1031168   ;;  %vm420_vm11 = vcmask 900096   ;;  %vm1191_vm12 = vmmov 0  }
  0x11   : > { %v366_v5 = vsub.s32 %v363_v4, %v365_v3  ;;  %v360_v8 = vcombine.high %v357_v6, %v357_v6  ;;  %v1042_v13 = vld.sshfl [vmem:[%s343_s18] sm:$0x3 pattern:$0x76325410]  ;;  %vm770_vm13 = vcmask 261120  }
  0x13   : > { %v1253_v7 = vrot.slane %v357_v6, %v366_v5  ;;  %v1263_v10 = vrot.slane %v360_v8, %v366_v5 }
  0x15   : > { %444 = vrot.lane.b32.xlu1 %v1253_v7, %s1181_s29  ;;  %v1259_v9 = vcombine.high %v1253_v7, %v1253_v7 }
  0x17   : > { %446 = vrot.lane.b32.xlu0 %v1259_v9, %s1181_s29 }
  0x19   : > { %489 = vrot.lane.b32.xlu1 %v1253_v7, %s1182_s30 }
  0x1b   : > { %448 = vrot.lane.b32.xlu0 %v1263_v10, %s1181_s29 }
  0x1d   : > { %461 = vrot.lane.b32.xlu1 %v1259_v9, %s1183_s7 }
  0x1f   : > { %463 = vrot.lane.b32.xlu0 %v1263_v10, %s1183_s7 }
  0x21   : > { %493 = vrot.lane.b32.xlu1 %v1263_v10, %s1182_s30 }
  0x23   : > { %491 = vrot.lane.b32.xlu0 %v1259_v9, %s1182_s30 }
  0x25   : > { %433 = vrot.lane.b32.xlu1 %v1263_v10, %s1184_s8 }
  0x27   : > { %431 = vrot.lane.b32.xlu0 %v1259_v9, %s1184_s8 }
  0x29   : > { %476 = vrot.lane.b32.xlu1 %v1259_v9, %s1185_s9 }
  0x2b   : > { %459 = vrot.lane.b32.xlu0 %v1253_v7, %s1183_s7 }
  0x2d   : > { %429 = vrot.lane.b32.xlu1 %v1253_v7, %s1184_s8 }
  0x2f   : > { %478 = vrot.lane.b32.xlu0 %v1263_v10, %s1185_s9 }
  0x31   : > { %378 = vrot.lane.b32.xlu1 %v1259_v9, %s1186_s10 }
  0x33   : > { %474 = vrot.lane.b32.xlu0 %v1253_v7, %s1185_s9 }
  0x35   : > { %376 = vrot.lane.b32.xlu1 %v1253_v7, %s1186_s10 }
  0x37   : > { %380 = vrot.lane.b32.xlu0 %v1263_v10, %s1186_s10 }
  0x39   : > { %403 = vrot.lane.b32.xlu1 %v1263_v10, %s1187_s11 }
  0x3b   : > { %401 = vrot.lane.b32.xlu0 %v1259_v9, %s1187_s11 }
  0x3d   : > { %416 = vrot.lane.b32.xlu1 %v1259_v9, %s1188_s15 }
  0x3f   : > { %399 = vrot.lane.b32.xlu0 %v1253_v7, %s1187_s11 }
  0x41   : > { %414 = vrot.lane.b32.xlu1 %v1253_v7, %s1188_s15 }
  0x43   : > { %418 = vrot.lane.b32.xlu0 %v1263_v10, %s1188_s15 }
  0x45   : > { %468 = vrot.lane.b32.xlu1 %v1042_v13, %s1183_s7 }
  0x47   : > { %453 = vrot.lane.b32.xlu0 %v1042_v13, %s1181_s29 }
  0x49   : > { %438 = vrot.lane.b32.xlu1 %v1042_v13, %s1184_s8 }
  0x4b   : > { %498 = vrot.lane.b32.xlu0 %v1042_v13, %s1182_s30 }
  0x4d   : > { %393 = vrot.lane.b32.xlu1 %v1042_v13, %s1186_s10 }
  0x4f   : > { %483 = vrot.lane.b32.xlu0 %v1042_v13, %s1185_s9 }
  0x51   : > { %423 = vrot.lane.b32.xlu1 %v1042_v13, %s1188_s15  ;;  %s1100_s15 = smul.u32 24, %s1444_s21 }
  0x53   : > { %408 = vrot.lane.b32.xlu0 %v1042_v13, %s1187_s11  ;;  %s354_s18 = scalar_lea.vmem %s1438_s6, %s1100_s15 }
  0x55   : > { %603 = vperm.xlu1 %1139, %v585_v14  }
  0x57   : > { %598 = vperm.xlu0 %1138, %v584_v15  }
  0x59   : > { %588 = vperm.xlu1 %1139, %v582_v16  }
  0x5b   : > { %593 = vperm.xlu0 %1138, %v583_v17  }
  0x5d   : > { %757 = vperm.xlu1 %1139, %v753_v18  }
  0x5f   : > { %762 = vperm.xlu0 %1138, %v754_v19  }
  0x87   : > { %v445_v20 = vpop.permute.xlu1 %444 }
  0x89   : > { %v447_v21 = vpop.permute.xlu0 %446 }
  0x8a   : > { %v451_v40 = vsel %vm450_vm3, %v445_v20, %v447_v21 }
  0x8b   : > { %v490_v22 = vpop.permute.xlu1 %489  ;;  %v517_v47 = vrot.slane %v451_v40, 6 }
  0x8d   : > { %v1338_v23 = vpop.permute.xlu0 %448 }
  0x8e   : > { %v452_v34 = vsel %vm450_vm3, %v447_v21, %v1338_v23 }
  0x8f   : > { %v462_v24 = vpop.permute.xlu1 %461  ;;  %v518_v37 = vrot.slane %v452_v34, 6 }
  0x91   : > { %v1340_v25 = vpop.permute.xlu0 %463 }
  0x92   : > { %v467_v38 = vsel %vm465_vm5, %v462_v24, %v1340_v25 }
  0x93   : > { %v1342_v26 = vpop.permute.xlu1 %493  ;;  %v522_v44 = vrot.slane %v467_v38, 4 }
  0x95   : > { %v492_v27 = vpop.permute.xlu0 %491 }
  0x96   : > { %v497_v28 = vsel %vm495_vm1, %v492_v27, %v1342_v26  ;;  %v496_v29 = vsel %vm495_vm1, %v490_v22, %v492_v27 }
  0x97   : > { %v1347_v30 = vpop.permute.xlu1 %433  ;;  %1045 = vmatprep.subr.msk.bf16.mxu0 %vm528_vm2, %v497_v28  ;;  %v624_v31 = vsel %vm528_vm2, %v496_v29, 0 }
  0x98   : > { %642 = vmatpush1.bf16.msra.mxu0 %v624_v31 }
  0x99   : > { %v432_v32 = vpop.permute.xlu0 %431 }
  0x9a   : > { %v437_v36 = vsel %vm435_vm4, %v432_v32, %v1347_v30 }
  0x9b   : > { %v477_v33 = vpop.permute.xlu1 %476  ;;  %v560_v41 = vsel %vm528_vm2, %v437_v36, %v518_v37 }
  0x9c   : > { %v566_v51 = vsel %vm538_vm7, %v560_v41, %v522_v44 }
  0x9d   : > { %v460_v35 = vpop.permute.xlu0 %459 }
  0x9e   : > { %v466_v42 = vsel %vm465_vm5, %v460_v35, %v462_v24 }
  0x9f   : > { %v430_v39 = vpop.permute.xlu1 %429  ;;  %v521_v50 = vrot.slane %v466_v42, 4 }
  0xa0   : > { %v436_v45 = vsel %vm435_vm4, %v430_v39, %v432_v32 }
  0xa1   : > { %v1360_v43 = vpop.permute.xlu0 %478  ;;  %v557_v52 = vsel %vm528_vm2, %v436_v45, %v517_v47 }
  0xa2   : > { %v482_v46 = vsel %vm480_vm6, %v477_v33, %v1360_v43  ;;  %v564_v58 = vsel %vm538_vm7, %v557_v52, %v521_v50 }
  0xa3   : > { %v526_v48 = vrot.slane %v482_v46, 2  ;;  %v379_v49 = vpop.permute.xlu1 %378 }
  0xa5   : > { %v475_v53 = vpop.permute.xlu0 %474  ;;  %v573_v54 = vsel %vm545_vm8, %v566_v51, %v526_v48 }
  0xa6   : > { %v481_v55 = vsel %vm480_vm6, %v475_v53, %v477_v33  ;;  %643 = vmatprep.subr.bf16.mxu0 %v573_v54  ;;  %v1190_v53 = vmov 0.0  }
  0xa7   : > { %v525_v56 = vrot.slane %v481_v55, 2  ;;  %v377_v57 = vpop.permute.xlu1 %376 }
  0xa8   : > { %v383_v63 = vsel %vm382_vm9, %v377_v57, %v379_v49 }
  0xa9   : > { %v381_v59 = vpop.permute.xlu0 %380  ;;  %v570_v60 = vsel %vm545_vm8, %v564_v58, %v525_v56  ;;  %v505_v4 = vrot.slane %v383_v63, 6 }
  0xaa   : > { %644 = vmatpush1.bf16.msra.mxu0 %v570_v60  ;;  %v384_v1 = vsel %vm382_vm9, %v379_v49, %v381_v59 }
  0xab   : > { %v404_v61 = vpop.permute.xlu1 %403  ;;  %v506_v6 = vrot.slane %v384_v1, 6  ;;  %v531_v19 = vsel %vm528_vm2, %v1253_v7, %v505_v4 }
  0xad   : > { %v402_v62 = vpop.permute.xlu0 %401  ;;  %v534_v22 = vsel %vm528_vm2, %v1259_v9, %v506_v6 }
  0xae   : > { %v407_v2 = vsel %vm405_vm10, %v402_v62, %v404_v61 }
  0xaf   : > { %v417_v0 = vpop.permute.xlu1 %416  ;;  %v510_v14 = vrot.slane %v407_v2, 4 }
  0xb1   : > { %v400_v3 = vpop.permute.xlu0 %399  ;;  %v542_v27 = vsel %vm538_vm7, %v534_v22, %v510_v14 }
  0xb2   : > { %v406_v5 = vsel %vm405_vm10, %v400_v3, %v402_v62 }
  0xb3   : > { %v509_v8 = vrot.slane %v406_v5, 4  ;;  %v415_v13 = vpop.permute.xlu1 %414 }
  0xb4   : > { %v421_v15 = vsel %vm420_vm11, %v415_v13, %v417_v0 }
  0xb5   : > { %v419_v16 = vpop.permute.xlu0 %418  ;;  %v513_v17 = vrot.slane %v421_v15, 2  ;;  %v540_v24 = vsel %vm538_vm7, %v531_v19, %v509_v8 }
  0xb6   : > { %v422_v18 = vsel %vm420_vm11, %v417_v0, %v419_v16 }
  0xb7   : > { %v514_v20 = vrot.slane %v422_v18, 2  ;;  %v469_v21 = vpop.permute.xlu1 %468  ;;  %v547_v32 = vsel %vm545_vm8, %v540_v24, %v513_v17 }
  0xb8   : > { %v473_v36 = vsel %vm465_vm5, %v1340_v25, %v469_v21  ;;  %v1142_v25 = vld [vmem:[%s1434_s2 + $0x8] sm:$0xff]  }
  0xb9   : > { %v454_v28 = vpop.permute.xlu0 %453  ;;  %v550_v29 = vsel %vm545_vm8, %v542_v27, %v514_v20 }
  0xba   : > { %v458_v31 = vsel %vm450_vm3, %v1338_v23, %v454_v28  ;;  %645 = vmatprep.subr.bf16.mxu0 %v550_v29 }
  0xbb   : > { %v439_v33 = vpop.permute.xlu1 %438  ;;  %646 = vmatpush1.bf16.msra.mxu0 %v547_v32  ;;  %v519_v7 = vrot.slane %v458_v31, 6 }
  0xbc   : > { %v443_v9 = vsel %vm435_vm4, %v1347_v30, %v439_v33  ;;  %1089 = vmatprep.subr.bf16.mxu0 %v1190_v53 }
  0xbd   : > { %v499_v34 = vpop.permute.xlu0 %498  ;;  %v562_v38 = vsel %vm528_vm2, %v443_v9, %v519_v7 }
  0xbe   : > { %1046 = vmatmul.mubr.msk.bf16.vlgmr.msra.gmra.mxu0 %vm616_vm0, %v1301_v11  ;;  %v503_v35 = vsel %vm495_vm1, %v1342_v26, %v499_v34  ;;  %v523_v11 = vrot.slane %v473_v36, 4 }
  0xbf   : > { %v394_v23 = vpop.permute.xlu1 %393  ;;  %1097 = vmatprep.subr.msk.bf16.mxu1 %vm528_vm2, %v503_v35  ;;  %v629_v37 = vsel %vm528_vm2, %v503_v35, 0  ;;  %673 = vmatprep.mubr.bf16.mxu0 %v1189_v12 }
  0xc0   : > { %1080 = vmatpush3.bf16.msra.mxu1 %v629_v37  ;;  %v398_v30 = vsel %vm382_vm9, %v381_v59, %v394_v23  ;;  %v568_v44 = vsel %vm538_vm7, %v562_v38, %v523_v11  ;;  %v1143_v23 = vld [vmem:[%s1436_s4] sm:$0x3f]  }
  0xc1   : > { %v484_v39 = vpop.permute.xlu0 %483  ;;  %v507_v42 = vrot.slane %v398_v30, 6 }
  0xc2   : > { %v488_v26 = vsel %vm480_vm6, %v1360_v43, %v484_v39 }
  0xc3   : > { %v527_v40 = vrot.slane %v488_v26, 2  ;;  %v424_v41 = vpop.permute.xlu1 %423  ;;  %v537_v50 = vsel %vm528_vm2, %v1263_v10, %v507_v42 }
  0xc4   : > { %v428_v45 = vsel %vm420_vm11, %v419_v16, %v424_v41 }
  0xc5   : > { %v409_v46 = vpop.permute.xlu0 %408  ;;  %v576_v47 = vsel %vm545_vm8, %v568_v44, %v527_v40  ;;  %v515_v49 = vrot.slane %v428_v45, 2 }
  0xc6   : > { %v413_v48 = vsel %vm405_vm10, %v404_v61, %v409_v46  ;;  %1047 = vmatmul.mubr.msk.bf16.gmra.mxu0 %vm616_vm0, %v1142_v25  ;;  %1081 = vmatprep.subr.bf16.mxu1 %v576_v47 }
  0xc7   : > { %v511_v43 = vrot.slane %v413_v48, 4  ;;  %1082 = vmatpush3.bf16.msra.mxu1 %v576_v47  ;;  %1093 = vmatprep.mubr.msk.bf16.mxu0 %vm1191_vm12, %v1190_v53 }
  0xc9   : > { %v544_v51 = vsel %vm538_vm7, %v537_v50, %v511_v43 }
  0xca   : > { %v553_v52 = vsel %vm545_vm8, %v544_v51, %v515_v49 }
  0xcb   : > { %1083 = vmatprep.subr.bf16.mxu1 %v553_v52 }
  0xcc   : > { %1084 = vmatpush3.bf16.msra.mxu1 %v553_v52 }
  0xcf   : > { %1086 = vmatmul.mubr.msk.bf16.vlgmr.msra.gmra.mxu1 %vm616_vm0, %v1142_v25 }
  0xd0   : > { %806 = vmatprep.mubr.bf16.mxu1 %v1189_v12  ;;  %v604_v57 = vpop.permute.xlu1 %603 }
  0xd2   : > { %v599_v10 = vpop.permute.xlu0 %598 }
  0xd4   : > { %v589_v61 = vpop.permute.xlu1 %588 }
  0xd6   : > { %v594_v0 = vpop.permute.xlu0 %593 }
  0xd8   : > { %v758_v11 = vpop.permute.xlu1 %757 }
  0xda   : > { %v763_v45 = vpop.permute.xlu0 %762 }
 0x17e   : > { %v665_v54 = vpop.f32.mrf.mxu0 }
 0x17f   : > { %v666_v4 = vadd.f32 %v665_v54, %v589_v61 }
 0x180   : > { %v667_v55 = vpop.f32.mrf.mxu0 }
 0x181   : > { %v668_v5 = vadd.f32 %v667_v55, %v589_v61  ;;  %v733_v19 = vmax.f32 %v666_v4, 0.0 }
 0x182   : > { %v669_v56 = vpop.f32.mrf.mxu0 }
 0x183   : > { %v670_v6 = vadd.f32 %v669_v56, %v594_v0  ;;  %v734_v20 = vmax.f32 %v668_v5, 0.0 }
 0x184   : > { %v671_v58 = vpop.f32.mrf.mxu0 }
 0x185   : > { %v672_v3 = vadd.f32 %v671_v58, %v594_v0  ;;  %v736_v21 = vmax.f32 %v670_v6, 0.0 }
 0x186   : > { %v675_v59 = vpop.f32.mrf.mxu0 }
 0x187   : > { %v676_v62 = vadd.f32 %v675_v59, %v599_v10  ;;  %v737_v16 = vmax.f32 %v672_v3, 0.0  ;;  %v747_v33 = vpack.c.bf16 %v736_v21, %v733_v19 }
 0x188   : > { %v677_v60 = vpop.f32.mrf.mxu0 }
 0x189   : > { %v678_v1 = vadd.f32 %v677_v60, %v599_v10  ;;  %v739_v13 = vmax.f32 %v676_v62, 0.0  ;;  %v748_v31 = vpack.c.bf16 %v737_v16, %v734_v20 }
 0x18a   : > { %v679_v63 = vpop.f32.mrf.mxu0 }
 0x18b   : > { %v680_v2 = vadd.f32 %v679_v63, %v604_v57  ;;  %v740_v15 = vmax.f32 %v678_v1, 0.0 }
 0x18c   : > { %v681_v12 = vpop.f32.mrf.mxu0 }
 0x18d   : > { %v682_v8 = vadd.f32 %v681_v12, %v604_v57  ;;  %v742_v14 = vmax.f32 %v680_v2, 0.0 }
 0x18f   : > { %v743_v17 = vmax.f32 %v682_v8, 0.0  ;;  %v1087_v18 = vpop.f32.mrf.mxu1  ;;  %v750_v27 = vpack.c.bf16 %v742_v14, %v739_v13 }
 0x190   : > { %v727_v28 = vadd.f32 %v1087_v18, %v599_v10 }
 0x191   : > { %v751_v22 = vpack.c.bf16 %v743_v17, %v740_v15  ;;  %v718_v24 = vpop.f32.mrf.mxu1 }
 0x192   : > { %v741_v34 = vmax.f32 %v727_v28, 0.0  ;;  %v719_v9 = vadd.f32 %v718_v24, %v589_v61 }
 0x193   : > { %v1088_v29 = vpop.f32.mrf.mxu1  ;;  %786 = vmatprep.subr.bf16.mxu1 %v751_v22 }
 0x194   : > { %v730_v32 = vadd.f32 %v1088_v29, %v604_v57  ;;  %787 = vmatpush1.bf16.msra.mxu1 %v750_v27  ;;  %v735_v30 = vmax.f32 %v719_v9, 0.0 }
 0x195   : > { %v721_v7 = vpop.f32.mrf.mxu1  ;;  %788 = vmatprep.subr.bf16.mxu1 %v748_v31 }
 0x196   : > { %v744_v35 = vmax.f32 %v730_v32, 0.0  ;;  %v722_v36 = vadd.f32 %v721_v7, %v594_v0 }
 0x198   : > { %v752_v37 = vpack.c.bf16 %v744_v35, %v741_v34  ;;  %v738_v38 = vmax.f32 %v722_v36, 0.0  ;;  %789 = vmatpush1.bf16.msra.mxu1 %v747_v33 }
 0x19a   : > { %1090 = vmatpush3.bf16.msra.mxu0 %v752_v37  ;;  %v749_v39 = vpack.c.bf16 %v738_v38, %v735_v30 }
 0x19b   : > { %1051 = vmatmul.mubr.msk.bf16.vlgmr.msra.gmra.mxu1 %vm770_vm13, %v1143_v23  ;;  %1091 = vmatprep.subr.bf16.mxu0 %v1190_v53 }
 0x19e   : > { %1092 = vmatpush3.bf16.msra.mxu0 %v749_v39 }
 0x1a1   : > { %1094 = vmatmul.mubr.msk.bf16.vlgmr.msra.gmra.mxu0 %vm770_vm13, %v1143_v23 }
 0x25b   : > { %v808_v26 = vpop.f32.mrf.mxu1 }
 0x25c   : > { %v809_v25 = vadd.f32 %v808_v26, %v758_v11 }
 0x25d   : > { %v810_v40 = vpop.f32.mrf.mxu1 }
 0x25e   : > { %v1053_v41 = vmul.f32 -1.442695, %v809_v25  ;;  %v811_v42 = vadd.f32 %v810_v40, %v758_v11 }
 0x25f   : > { %v812_v44 = vpop.f32.mrf.mxu1 }
 0x260   : > { %1144 = vpow2.f32 %v1053_v41  ;;  %v1054_v46 = vmul.f32 -1.442695, %v811_v42  ;;  %v813_v43 = vadd.f32 %v812_v44, %v763_v45 }
 0x261   : > { %v814_v47 = vpop.f32.mrf.mxu1  ;;  %v851_v48 = vpop.f32.mrf.mxu0 }
 0x262   : > { %1146 = vpow2.f32 %v1054_v46  ;;  %v815_v49 = vadd.f32 %v814_v47, %v763_v45  ;;  %v852_v50 = vadd.f32 %v851_v48, %v758_v11 }
 0x263   : > { %v1095_v51 = vpop.f32.mrf.mxu0 }
 0x264   : > { %v1069_v52 = vpack.c.bf16 %v815_v49, %v813_v43  ;;  %v1055_v53 = vmul.f32 -1.442695, %v852_v50 }
 0x265   : > { %v854_v54 = vpop.f32.mrf.mxu0 }
 0x266   : > { %927 = vst [vmem:[%s354_s18 + $0xc] sm:$0x33] %v1069_v52  ;;  %1148 = vpow2.f32 %v1055_v53  ;;  %v855_v55 = vadd.f32 %v854_v54, %v763_v45 }
 0x267   : > { %v1096_v56 = vpop.f32.mrf.mxu0 }
 0x268   : > { %v1070_v57 = vpack.c.bf16 %v855_v55, %v855_v55 }
 0x26a   : > { %928 = vst [vmem:[%s354_s18 + $0x14] sm:$0x3] %v1070_v57 }
 0x26d   : > { %v1145_v58 = vpop.eup %1144 }
 0x26e   : > { %v881_v10 = vadd.f32 1.0, %v1145_v58 }
 0x26f   : > { %v1147_v59 = vpop.eup %1146 }
 0x270   : > { %v882_v60 = vadd.f32 1.0, %v1147_v59  ;;  %1150 = vrcp.f32 %v881_v10 }
 0x272   : > { %1152 = vrcp.f32 %v882_v60 }
 0x273   : > { %v1149_v61 = vpop.eup %1148 }
 0x274   : > { %v883_v62 = vadd.f32 1.0, %v1149_v61 }
 0x276   : > { %1154 = vrcp.f32 %v883_v62 }
 0x27d   : > { %v1151_v63 = vpop.eup %1150 }
 0x27f   : > { %v1153_v0 = vpop.eup %1152 }
 0x280   : > { %v1067_v1 = vpack.c.bf16 %v1153_v0, %v1151_v63 }
 0x282   : > { %925 = vst [vmem:[%s354_s18] sm:$0xff] %v1067_v1 }
 0x283   : > { %v1155_v2 = vpop.eup %1154 }
 0x284   : > { %v1068_v3 = vpack.c.bf16 %v1155_v2, %v1155_v2 }
 0x286   : > { %926 = vst [vmem:[%s354_s18 + $0x8] sm:$0xf] %v1068_v3 }
 0x287 PF: > { %s16_s23 = sadd.s32 1, %s1178_s23   ;;  %s1439_s21 = smov %s1174_s22 }
 0x288   : > { %p13_p5 = scmp.ge.s32.totalorder %s16_s23, 4   ;;  %s1440_s22 = smov %s1442_s24 }
 0x28a   :  { %15 = sbr.rel (!%p13_p5) target bundleno = 2 (0x2), region = 77 }

</bundles_post_ra>
